<compile_context>
chip_gen: v7x
topology: tpu7x:2x2x1
jax: 0.10.0
libtpu: 0.0.40
codegen_flags: <defaults>
</compile_context>

<pallas_src>
from functools import partial

import jax
import jax.numpy as jnp
from jax.experimental import pallas as pl
from jax.experimental.pallas import tpu as pltpu

BN_EPS = 1e-5


def _round_up(x, m):
    return (x + m - 1) // m * m


def _pick_row_tile(rows, cin_p, cout_p, in_itemsize,
                   budget_bytes=8 * 1024 * 1024, max_tile=2048):
    """Largest row tile (multiple of 128) whose double-buffered in+out tiles fit."""
    per_row = 2 * cin_p * in_itemsize + 2 * cout_p * 4
    tile = max(128, min(max_tile, (budget_bytes // per_row) // 128 * 128))
    rows_ceil = _round_up(max(rows, 1), 128)
    return int(min(tile, rows_ceil))


def _stats_kernel(xt_ref, gram_ref, sumx_ref):
    """Accumulate Gram = X X^T and sum_x over the (sequential) rows grid."""
    @pl.when(pl.program_id(0) == 0)
    def _init():
        gram_ref[...] = jnp.zeros_like(gram_ref)
        sumx_ref[...] = jnp.zeros_like(sumx_ref)

    x = xt_ref[...]                                      # (Cin_p, row_tile)
    gram_ref[...] += jax.lax.dot_general(                # X X^T on the MXU
        x, x, (((1,), (1,)), ((), ())),
        preferred_element_type=jnp.float32)
    sumx_ref[...] += jnp.sum(x.astype(jnp.float32), axis=1, keepdims=True)


def _apply_kernel(xt_ref, w_ref, b_ref, o_ref):
    """o = relu(W_folded @ X^T + bias): matmul + fused affine + relu."""
    y = jnp.dot(w_ref[...], xt_ref[...],                 # (Cout_p, row_tile)
                preferred_element_type=jnp.float32)
    o_ref[...] = jnp.maximum(y + b_ref[...], 0.0).astype(o_ref.dtype)


@partial(jax.jit, static_argnames=("compute_dtype", "row_tile"))
def block_forward(x_nchw, w, gamma, beta, *, compute_dtype=jnp.float32,
                  row_tile=None):
    """Block forward: 1x1 conv (no bias) -> BatchNorm2d (batch stats) -> relu.

    x_nchw: (N, Cin, H, W); w: (Cout, Cin) 1x1-conv weight; gamma/beta: (Cout,).
    Returns (N, Cout, H, W) float32.
    """
    n, cin, h, wd = x_nchw.shape
    cout = w.shape[0]
    rows = n * h * wd

    cin_p = _round_up(cin, 8)
    cout_p = _round_up(cout, 8)
    in_itemsize = jnp.dtype(compute_dtype).itemsize
    if row_tile is None:
        row_tile = _pick_row_tile(rows, cin_p, cout_p, in_itemsize)
    rows_p = _round_up(rows, row_tile)
    grid = (rows_p // row_tile,)

    # VMEM budget implied by the chosen tiles (double-buffered in/out + params).
    step_bytes = (2 * cin_p * row_tile * in_itemsize
                  + 2 * cout_p * row_tile * 4
                  + cin_p * cin_p * 4 + cout_p * cin_p * in_itemsize
                  + (cin_p + cout_p) * 4)
    vmem_limit = int(min(48 * 1024 * 1024, max(16 * 1024 * 1024, 2 * step_bytes)))

    # --- layout: NCHW -> (Cin, rows) with rows on the lane axis; pad to tiles ---
    xt = jnp.transpose(x_nchw, (1, 0, 2, 3)).reshape(cin, rows)
    xt = jnp.pad(xt, ((0, cin_p - cin), (0, rows_p - rows))).astype(compute_dtype)

    w_p = jnp.pad(w.astype(jnp.float32), ((0, cout_p - cout), (0, cin_p - cin)))
    gamma_p = jnp.pad(gamma.astype(jnp.float32), (0, cout_p - cout))
    beta_p = jnp.pad(beta.astype(jnp.float32), (0, cout_p - cout))

    # --- pass 1: per-channel statistics of X (tiled reduction over rows) ---
    gram, sumx = pl.pallas_call(
        _stats_kernel,
        out_shape=(jax.ShapeDtypeStruct((cin_p, cin_p), jnp.float32),
                   jax.ShapeDtypeStruct((cin_p, 1), jnp.float32)),
        grid=grid,
        in_specs=[pl.BlockSpec((cin_p, row_tile), lambda i: (0, i))],
        out_specs=(pl.BlockSpec((cin_p, cin_p), lambda i: (0, 0)),
                   pl.BlockSpec((cin_p, 1), lambda i: (0, 0))),
        compiler_params=pltpu.CompilerParams(
            dimension_semantics=("arbitrary",),
            vmem_limit_bytes=vmem_limit),
    )(xt)

    # --- fold BN (batch stats, global over all N*H*W rows) into W and a bias ---
    hp = jax.lax.Precision.HIGHEST
    w_used = w_p.astype(compute_dtype).astype(jnp.float32)        # what the MXU sees
    mean = jnp.dot(w_used, sumx, precision=hp) / rows             # (Cout_p, 1)
    sumsq = jnp.sum(jnp.dot(w_used, gram, precision=hp) * w_used,
                    axis=1, keepdims=True)                        # (Cout_p, 1)
    var = jnp.maximum(sumsq / rows - mean * mean, 0.0)            # biased variance
    scale = gamma_p[:, None] * jax.lax.rsqrt(var + BN_EPS)        # (Cout_p, 1)
    w_folded = (w_p * scale).astype(compute_dtype)                # (Cout_p, Cin_p)
    bias = beta_p[:, None] - mean * scale                         # (Cout_p, 1) f32

    # --- pass 2: tiled matmul + fused affine + relu (lane-dense output) ---
    out_t = pl.pallas_call(
        _apply_kernel,
        out_shape=jax.ShapeDtypeStruct((cout_p, rows_p), jnp.float32),
        grid=grid,
        in_specs=[pl.BlockSpec((cin_p, row_tile), lambda i: (0, i)),
                  pl.BlockSpec((cout_p, cin_p), lambda i: (0, 0)),
                  pl.BlockSpec((cout_p, 1), lambda i: (0, 0))],
        out_specs=pl.BlockSpec((cout_p, row_tile), lambda i: (0, i)),
        compiler_params=pltpu.CompilerParams(
            dimension_semantics=("parallel",),
            vmem_limit_bytes=vmem_limit),
    )(xt, w_folded, bias)

    # (Cout, rows) -> NCHW
    out = out_t[:cout, :rows].reshape(cout, n, h, wd)
    return jnp.transpose(out, (1, 0, 2, 3))


def block_reference(x_nchw, w, gamma, beta):
    """Plain-JAX f32 reference: 1x1 conv (no bias) -> BN (train mode) -> relu."""
    hp = jax.lax.Precision.HIGHEST
    y = jnp.einsum("nchw,oc->nohw", x_nchw.astype(jnp.float32),
                   w.astype(jnp.float32), precision=hp)
    mean = jnp.mean(y, axis=(0, 2, 3), keepdims=True)
    var = jnp.mean((y - mean) ** 2, axis=(0, 2, 3), keepdims=True)
    y = (y - mean) * jax.lax.rsqrt(var + BN_EPS)
    y = y * gamma.reshape(1, -1, 1, 1) + beta.reshape(1, -1, 1, 1)
    return jnp.maximum(y, 0.0)


if __name__ == "__main__":
    key = jax.random.PRNGKey(0)
    k_x, k_w, k_g, k_b = jax.random.split(key, 4)

    N, C_IN, H, W = 2, 4, 16, 16
    C_OUT = 8

    x = jax.random.normal(k_x, (N, C_IN, H, W), dtype=jnp.float32)
    w = 0.1 * jax.random.normal(k_w, (C_OUT, C_IN), dtype=jnp.float32)   # 1x1 conv
    gamma = 1.0 + 0.05 * jax.random.normal(k_g, (C_OUT,), dtype=jnp.float32)
    beta = 0.05 * jax.random.normal(k_b, (C_OUT,), dtype=jnp.float32)

    ref = jax.block_until_ready(block_reference(x, w, gamma, beta))

    # Tolerances are sized to stay robust to how the MXU handles f32 matmuls
    # (multi-pass f32 vs bf16-pass defaults); with full f32 passes the f32 path
    # agrees with the reference to ~1e-5.

    # f32 path, auto-picked row tile.
    out = jax.block_until_ready(block_forward(x, w, gamma, beta))
    assert out.shape == (N, C_OUT, H, W), out.shape
    assert jnp.allclose(out, ref, atol=2e-2, rtol=2e-2), \
        float(jnp.max(jnp.abs(out - ref)))

    # f32 path, forced multi-tile grid (exercises tiling + global BN statistics).
    out_tiled = jax.block_until_ready(
        block_forward(x, w, gamma, beta, row_tile=128))
    assert jnp.allclose(out_tiled, ref, atol=2e-2, rtol=2e-2), \
        float(jnp.max(jnp.abs(out_tiled - ref)))

    # bf16 MXU/storage path (production setting): looser tolerance for bf16 inputs.
    out_bf16 = jax.block_until_ready(
        block_forward(x, w, gamma, beta, compute_dtype=jnp.bfloat16, row_tile=128))
    assert jnp.allclose(out_bf16, ref, atol=5e-2, rtol=5e-2), \
        float(jnp.max(jnp.abs(out_bf16 - ref)))

    print("KERNEL_OK")
</pallas_src>

<mosaic_0001>
module attributes {stable_mosaic.version = 11 : i64} {
  func.func @_stats_kernel(%arg0: i32, %arg1: memref<8x512xf32, #tpu.memory_space<vmem>>, %arg2: memref<8x8xf32, #tpu.memory_space<vmem>>, %arg3: memref<8x1xf32, #tpu.memory_space<vmem>>) attributes {dimension_semantics = [#tpu.dimension_semantics<arbitrary>], iteration_bounds = array<i64: 1>, scalar_prefetch = 0 : i64, scratch_operands = 0 : i64, tpu.core_type = #tpu.core_type<tc>, window_params = [{transform_indices = @transform_0, window_bounds = array<i64: 8, 512>}, {pipeline_mode = #tpu.pipeline_mode<synchronous>, transform_indices = @transform_1, window_bounds = array<i64: 8, 8>}, {pipeline_mode = #tpu.pipeline_mode<synchronous>, transform_indices = @transform_2, window_bounds = array<i64: 8, 1>}]} {
    %c0_i32 = arith.constant 0 : i32
    %0 = arith.cmpi eq, %arg0, %c0_i32 : i32
    %1 = arith.extui %0 : i1 to i32
    %c0_i32_0 = arith.constant 0 : i32
    %2 = arith.cmpi ne, %1, %c0_i32_0 : i32
    scf.if %2 {
      %cst_11 = arith.constant 0.000000e+00 : f32
      %13 = vector.broadcast %cst_11 : f32 to vector<8x8xf32>
      %c0_12 = arith.constant 0 : index
      %c0_13 = arith.constant 0 : index
      %14 = vector.load %arg2[%c0_12, %c0_13] : memref<8x8xf32, #tpu.memory_space<vmem>>, vector<8x8xf32>
      tpu.vector_store %arg2[%c0_12, %c0_13], %13 {strides = array<i32>} : memref<8x8xf32, #tpu.memory_space<vmem>>, vector<8x8xf32>,
      %cst_14 = arith.constant 0.000000e+00 : f32
      %15 = vector.broadcast %cst_14 : f32 to vector<8x1xf32>
      %c0_15 = arith.constant 0 : index
      %c0_16 = arith.constant 0 : index
      %16 = vector.load %arg3[%c0_15, %c0_16] : memref<8x1xf32, #tpu.memory_space<vmem>>, vector<8x1xf32>
      tpu.vector_store %arg3[%c0_15, %c0_16], %15 {strides = array<i32>} : memref<8x1xf32, #tpu.memory_space<vmem>>, vector<8x1xf32>,
    } else {
    }
    %c0 = arith.constant 0 : index
    %c0_1 = arith.constant 0 : index
    %3 = vector.load %arg1[%c0, %c0_1] : memref<8x512xf32, #tpu.memory_space<vmem>>, vector<8x512xf32>
    %c0_2 = arith.constant 0 : index
    %c0_3 = arith.constant 0 : index
    %4 = vector.load %arg2[%c0_2, %c0_3] : memref<8x8xf32, #tpu.memory_space<vmem>>, vector<8x8xf32>
    %cst = arith.constant dense<0.000000e+00> : vector<8x8xf32>
    %5 = tpu.matmul %3, %3, %cst {dimension_numbers = #tpu.dot_dimension_numbers<[1], [1], [0], [0], [0, 0, 1, 0], [], []>} : vector<8x512xf32>, vector<8x512xf32>, vector<8x8xf32> -> vector<8x8xf32>
    %6 = arith.addf %4, %5 : vector<8x8xf32>
    %c0_4 = arith.constant 0 : index
    %c0_5 = arith.constant 0 : index
    %7 = vector.load %arg2[%c0_4, %c0_5] : memref<8x8xf32, #tpu.memory_space<vmem>>, vector<8x8xf32>
    tpu.vector_store %arg2[%c0_4, %c0_5], %6 {strides = array<i32>} : memref<8x8xf32, #tpu.memory_space<vmem>>, vector<8x8xf32>,
    %c0_6 = arith.constant 0 : index
    %c0_7 = arith.constant 0 : index
    %8 = vector.load %arg3[%c0_6, %c0_7] : memref<8x1xf32, #tpu.memory_space<vmem>>, vector<8x1xf32>
    %cst_8 = arith.constant dense<0.000000e+00> : vector<8xf32>
    %9 = vector.multi_reduction <add>, %3, %cst_8 [1] : vector<8x512xf32> to vector<8xf32>
    %10 = vector.shape_cast %9 : vector<8xf32> to vector<8x1xf32>
    %11 = arith.addf %8, %10 : vector<8x1xf32>
    %c0_9 = arith.constant 0 : index
    %c0_10 = arith.constant 0 : index
    %12 = vector.load %arg3[%c0_9, %c0_10] : memref<8x1xf32, #tpu.memory_space<vmem>>, vector<8x1xf32>
    tpu.vector_store %arg3[%c0_9, %c0_10], %11 {strides = array<i32>} : memref<8x1xf32, #tpu.memory_space<vmem>>, vector<8x1xf32>,
    return
  }
  func.func @transform_0(%arg0: i32) -> (i32, i32) {
    %c0_i32 = arith.constant 0 : i32
    %c0_i32_0 = arith.constant 0 : i32
    return %c0_i32, %arg0 : i32, i32
  }
  func.func @transform_1(%arg0: i32) -> (i32, i32) {
    %c0_i32 = arith.constant 0 : i32
    %c0_i32_0 = arith.constant 0 : i32
    %c0_i32_1 = arith.constant 0 : i32
    return %c0_i32, %c0_i32_0 : i32, i32
  }
  func.func @transform_2(%arg0: i32) -> (i32, i32) {
    %c0_i32 = arith.constant 0 : i32
    %c0_i32_0 = arith.constant 0 : i32
    %c0_i32_1 = arith.constant 0 : i32
    return %c0_i32, %c0_i32_0 : i32, i32
  }
}

module attributes {stable_mosaic.version = 11 : i64} {
  func.func @_apply_kernel(%arg0: i32, %arg1: memref<8x512xf32, #tpu.memory_space<vmem>>, %arg2: memref<8x8xf32, #tpu.memory_space<vmem>>, %arg3: memref<8x1xf32, #tpu.memory_space<vmem>>, %arg4: memref<8x512xf32, #tpu.memory_space<vmem>>) attributes {dimension_semantics = [#tpu.dimension_semantics<parallel>], iteration_bounds = array<i64: 1>, scalar_prefetch = 0 : i64, scratch_operands = 0 : i64, tpu.core_type = #tpu.core_type<tc>, window_params = [{transform_indices = @transform_0, window_bounds = array<i64: 8, 512>}, {pipeline_mode = #tpu.pipeline_mode<synchronous>, transform_indices = @transform_1, window_bounds = array<i64: 8, 8>}, {pipeline_mode = #tpu.pipeline_mode<synchronous>, transform_indices = @transform_2, window_bounds = array<i64: 8, 1>}, {transform_indices = @transform_3, window_bounds = array<i64: 8, 512>}]} {
    %c0 = arith.constant 0 : index
    %c0_0 = arith.constant 0 : index
    %0 = vector.load %arg2[%c0, %c0_0] : memref<8x8xf32, #tpu.memory_space<vmem>>, vector<8x8xf32>
    %c0_1 = arith.constant 0 : index
    %c0_2 = arith.constant 0 : index
    %1 = vector.load %arg1[%c0_1, %c0_2] : memref<8x512xf32, #tpu.memory_space<vmem>>, vector<8x512xf32>
    %cst = arith.constant dense<0.000000e+00> : vector<8x512xf32>
    %2 = tpu.matmul %0, %1, %cst {dimension_numbers = #tpu.dot_dimension_numbers<[1], [0], [0], [1], [0, 0, 1, 1], [], []>} : vector<8x8xf32>, vector<8x512xf32>, vector<8x512xf32> -> vector<8x512xf32>
    %c0_3 = arith.constant 0 : index
    %c0_4 = arith.constant 0 : index
    %3 = vector.load %arg3[%c0_3, %c0_4] : memref<8x1xf32, #tpu.memory_space<vmem>>, vector<8x1xf32>
    %4 = vector.broadcast %3 : vector<8x1xf32> to vector<8x512xf32>
    %5 = arith.addf %2, %4 : vector<8x512xf32>
    %cst_5 = arith.constant 0.000000e+00 : f32
    %6 = vector.broadcast %cst_5 : f32 to vector<8x512xf32>
    %7 = arith.maximumf %5, %6 : vector<8x512xf32>
    %c0_6 = arith.constant 0 : index
    %c0_7 = arith.constant 0 : index
    %8 = vector.load %arg4[%c0_6, %c0_7] : memref<8x512xf32, #tpu.memory_space<vmem>>, vector<8x512xf32>
    tpu.vector_store %arg4[%c0_6, %c0_7], %7 {strides = array<i32>} : memref<8x512xf32, #tpu.memory_space<vmem>>, vector<8x512xf32>,
    return
  }
  func.func @transform_0(%arg0: i32) -> (i32, i32) {
    %c0_i32 = arith.constant 0 : i32
    %c0_i32_0 = arith.constant 0 : i32
    return %c0_i32, %arg0 : i32, i32
  }
  func.func @transform_1(%arg0: i32) -> (i32, i32) {
    %c0_i32 = arith.constant 0 : i32
    %c0_i32_0 = arith.constant 0 : i32
    %c0_i32_1 = arith.constant 0 : i32
    return %c0_i32, %c0_i32_0 : i32, i32
  }
  func.func @transform_2(%arg0: i32) -> (i32, i32) {
    %c0_i32 = arith.constant 0 : i32
    %c0_i32_0 = arith.constant 0 : i32
    %c0_i32_1 = arith.constant 0 : i32
    return %c0_i32, %c0_i32_0 : i32, i32
  }
  func.func @transform_3(%arg0: i32) -> (i32, i32) {
    %c0_i32 = arith.constant 0 : i32
    %c0_i32_0 = arith.constant 0 : i32
    return %c0_i32, %arg0 : i32, i32
  }
}

</mosaic_0001>

<bundles_post_ra>
// kernel: block_forward.3
= control target key start
LH: loop header
LB: loop body
LE: loop exit
PB: predicated region body
PF: predicated region fallthrough
CT: control target
= control target key end

     0   :  { %v188_v3 = vmov 0.0   ;;  %vm25_vm0 = vcmask 64512   ;;  %v189_v7 = vmov 0   ;;  %s240_s0 = inlined_call_operand.vmem [shape: f32[8,512], index: 0, kind: input, shape index: {}]   ;;  %s241_s1 = inlined_call_operand.vmem [shape: f32[8,8], index: 1, kind: input, shape index: {}]   ;;  %s242_s2 = inlined_call_operand.vmem [shape: f32[8,1], index: 2, kind: input, shape index: {}]   ;;  %s243_s3 = inlined_call_operand.vmem [shape: f32[8,512], index: 3, kind: output, shape index: {}]  }
   0x1   :  { %v16_v0 = vld [vmem:[%s240_s0 + $0x8] sm:$0xff]  ;;  %v18_v1 = vld [vmem:[%s240_s0 + $0x18] sm:$0xff]  ;;  %v15_v2 = vld [vmem:[%s240_s0] sm:$0xff]  ;;  %93 = vmatprep.mubr.f32.mxu0 %v188_v3  ;;  %164 = vmatprep.mubr.f32.mxu1 %v188_v3 }
   0x2   :  { %29 = vmatprep.subr.mxu0 %v16_v0  ;;  %100 = vmatprep.subr.mxu1 %v18_v1  ;;  %v17_v4 = vld [vmem:[%s240_s0 + $0x10] sm:$0xff]  ;;  %v14_v5 = vld [vmem:[%s241_s1] sm:$0xff] }
   0x3   :  { %30 = vmatpush1.msra.mxu0 %v15_v2  ;;  %101 = vmatpush1.msra.mxu1 %v17_v4  ;;  %v19_v6 = vld [vmem:[%s242_s2] sm:$0xff] }
   0x4   :  { %183 = vmatmul.mubr.msk.f32.vlgmr.msra.gmra.mrb[0].mxu0 %vm25_vm0, %v14_v5  ;;  %184 = vmatmul.mubr.msk.f32.vlgmr.msra.gmra.mrb[0].mxu1 %vm25_vm0, %v14_v5 }
   0x5   :  { %187 = vset.pattern.permute.xlu0 %v189_v7 }
   0x6   :  { %22 = vperm.xlu0 %187, %v19_v6  }
  0x85   :  { %v23_v8 = vpop.permute.xlu0 %22 }
  0xd7   :  { %v95_v9 = vpop.f32.mrb[0].mxu0  ;;  %v166_v10 = vpop.f32.mrb[0].mxu1 }
  0xd8   :  { %v96_v11 = vadd.f32 %v95_v9, %v23_v8  ;;  %v167_v12 = vadd.f32 %v166_v10, %v23_v8  ;;  %v97_v13 = vpop.f32.mrb[1].mxu0  ;;  %v168_v14 = vpop.f32.mrb[1].mxu1 }
  0xd9   :  { %v98_v15 = vadd.f32 %v97_v13, %v23_v8  ;;  %v169_v16 = vadd.f32 %v168_v14, %v23_v8 }
  0xda   :  { %v171_v17 = vmax.f32 %v96_v11, 0.0  ;;  %v173_v18 = vmax.f32 %v167_v12, 0.0 }
  0xdb   :  { %v172_v19 = vmax.f32 %v98_v15, 0.0  ;;  %v174_v20 = vmax.f32 %v169_v16, 0.0 }
  0xdc   :  { %175 = vst [vmem:[%s243_s3] sm:$0xff] %v171_v17  ;;  %177 = vst [vmem:[%s243_s3 + $0x10] sm:$0xff] %v173_v18 }
  0xdd   :  { %176 = vst [vmem:[%s243_s3 + $0x8] sm:$0xff] %v172_v19  ;;  %178 = vst [vmem:[%s243_s3 + $0x18] sm:$0xff] %v174_v20 }

// kernel: block_forward.2
= control target key start
LH: loop header
LB: loop body
LE: loop exit
PB: predicated region body
PF: predicated region fallthrough
CT: control target
= control target key end

     0   :  { %vm14_vm0 = vcmask 64512   ;;  %vm16_vm1 = vcmask 7168   ;;  %v184_v7 = vmov 0.0   ;;  %s232_s0 = inlined_call_operand.vmem [shape: f32[8,512], index: 0, kind: input, shape index: {}]   ;;  %s233_s1 = inlined_call_operand.vmem [shape: f32[8,8], index: 1, kind: output, shape index: {0}]   ;;  %s234_s2 = inlined_call_operand.vmem [shape: f32[8,1], index: 2, kind: output, shape index: {1}]  }
   0x1   :  { %v19_v0 = vld [vmem:[%s232_s0 + $0x8] sm:$0xff]  ;;  %v21_v1 = vld [vmem:[%s232_s0 + $0x18] sm:$0xff]  ;;  %v18_v2 = vld [vmem:[%s232_s0] sm:$0xff]  ;;  %15 = vst.msk [vmem:[%s233_s1] sm:$0xff] %vm14_vm0, %v184_v7 }
   0x2   :  { %23 = vmatprep.subr.mxu0 %v19_v0  ;;  %93 = vmatprep.subr.mxu1 %v21_v1  ;;  %v20_v3 = vld [vmem:[%s232_s0 + $0x10] sm:$0xff]  ;;  %v167_v4 = vadd.f32 %v19_v0, %v18_v2  ;;  %17 = vst.msk [vmem:[%s234_s2] sm:$0xff] %vm16_vm1, %v184_v7 }
   0x3   :  { %24 = vmatpush1.xpose.msra.mxu0 %v18_v2  ;;  %94 = vmatpush1.xpose.msra.mxu1 %v20_v3 }
   0x4   :  { %87 = vmatprep.mubr.f32.mxu0 %v19_v0  ;;  %157 = vmatprep.mubr.f32.mxu1 %v21_v1  ;;  %v168_v5 = vadd.f32 %v167_v4, %v20_v3 }
   0x6   :  { %88 = vmatmul.mubr.f32.vlgmr.msra.gmra.mrb[0].mxu0 %v18_v2  ;;  %158 = vmatmul.mubr.f32.vlgmr.msra.gmra.mrb[0].mxu1 %v20_v3  ;;  %v169_v6 = vadd.f32 %v168_v5, %v21_v1 }
   0x8   :  { %170 = vadd.xlane.f32.xlu0 %v169_v6  ;;  %v22_v12 = vld [vmem:[%s233_s1] sm:$0xff] }
   0x9   :  { %v166_v8 = vld [vmem:[%s234_s2] sm:$0xff] }
  0x95   :  { %v171_v9 = vpop.xlane.xlu0 %170 }
  0x96   :  { %v172_v10 = vadd.f32 %v171_v9, %v166_v8 }
  0x98   :  { %174 = vst.msk [vmem:[%s234_s2] sm:$0xff] %vm16_vm1, %v172_v10 }
  0xd9   :  { %v89_v11 = vpop.f32.mrb[0].mxu0  ;;  %v159_v13 = vpop.f32.mrb[0].mxu1 }
  0xda   :  { %v160_v14 = vadd.f32 %v159_v13, %v89_v11  ;;  %v91_v15 = vpop.f32.mrb[1].mxu0  ;;  %v161_v16 = vpop.f32.mrb[1].mxu1 }
  0xdc   :  { %v163_v17 = vadd.f32 %v160_v14, %v22_v12 }
  0xde   :  { %165 = vst.msk [vmem:[%s233_s1] sm:$0xff] %vm14_vm0, %v163_v17 }

</bundles_post_ra>
